<compile_context>
chip_gen: v7x
topology: tpu7x:2x2x1
jax: 0.10.0
libtpu: 0.0.40
codegen_flags: <defaults>
</compile_context>

<pallas_src>
import math

import jax
import jax.numpy as jnp
from jax.experimental import pallas as pl
from jax.experimental.pallas import tpu as pltpu


def _dist2simi_kernel(w_ref, d_ref, o_ref):
    # w_ref: SMEM scalar-prefetch ref holding log(wei), shape (1,)
    # d_ref / o_ref: one (1, TR, N) row-tile in VMEM
    # exp(-D / exp(log_wei)) == exp(D * (-exp(-log_wei)))
    neg_inv = -jnp.exp(-w_ref[0])
    o_ref[...] = jnp.exp(d_ref[...] * neg_inv).astype(o_ref.dtype)


def _choose_row_tile(n: int, elem_bytes: int, target_bytes: int) -> int:
    """Pick a row-tile TR for a (TR, N) block.

    TR is either the full N (tiny inputs -> single step per batch) or a
    multiple of 8 (sublane constraint), preferably dividing N evenly, sized so
    one buffer is roughly `target_bytes`.
    """
    if n * n * elem_bytes <= target_bytes:
        return n
    max_rows = max(8, target_bytes // (n * elem_bytes))
    tr = max(8, min((max_rows // 8) * 8, n))
    # Prefer a divisor of N to avoid a ragged (masked) last tile.
    t = tr
    while t > 8 and n % t != 0:
        t -= 8
    if n % t == 0:
        tr = t
    return tr


def dist2simi(dist: jax.Array, log_wei: jax.Array, *, out_dtype=None,
              per_buffer_bytes: int = 4 << 20) -> jax.Array:
    """dist: (B, N, N) distance matrices; log_wei: (1,) = log(bandwidth)."""
    B, N, N2 = dist.shape
    assert N == N2, "expected square pairwise distance matrices"
    out_dtype = dist.dtype if out_dtype is None else out_dtype

    elem_bytes = jnp.dtype(dist.dtype).itemsize
    tr = _choose_row_tile(N, elem_bytes, per_buffer_bytes)
    grid = (B, pl.cdiv(N, tr))

    grid_spec = pltpu.PrefetchScalarGridSpec(
        num_scalar_prefetch=1,
        grid=grid,
        in_specs=[
            pl.BlockSpec((1, tr, N), lambda b, r, w: (b, r, 0)),
        ],
        out_specs=pl.BlockSpec((1, tr, N), lambda b, r, w: (b, r, 0)),
    )

    return pl.pallas_call(
        _dist2simi_kernel,
        out_shape=jax.ShapeDtypeStruct((B, N, N), out_dtype),
        grid_spec=grid_spec,
        compiler_params=pltpu.CompilerParams(
            dimension_semantics=("parallel", "parallel"),
            vmem_limit_bytes=48 << 20,
        ),
    )(log_wei.astype(jnp.float32), dist)


if __name__ == "__main__":
    key = jax.random.PRNGKey(0)

    # Small, deterministic example: B=2 batches of 128 points with 32 features,
    # distance matrix = pairwise squared euclidean distances (128 x 128).
    B, P, F = 2, 128, 32
    feats = jax.random.normal(key, (B, P, F), dtype=jnp.float32)
    sq_norm = jnp.sum(feats * feats, axis=-1)                     # (B, P)
    dist = (sq_norm[:, :, None] + sq_norm[:, None, :]
            - 2.0 * jnp.einsum("bpf,bqf->bpq", feats, feats))
    dist = jnp.maximum(dist, 0.0).astype(jnp.float32)             # (B, 128, 128)

    # Deterministic parameter init, as in the module: weights = log(wei)
    wei = 2.0
    log_wei = jnp.array([math.log(wei)], dtype=jnp.float32)

    out = dist2simi(dist, log_wei)
    out = jax.block_until_ready(out)

    # sanity check vs. plain-JAX reference
    ref = jnp.exp(-dist / jnp.exp(log_wei)[0])
    assert out.shape == dist.shape
    assert out.dtype == dist.dtype
    assert jnp.max(jnp.abs(out - ref)) < 1e-5

    print("KERNEL_OK")
</pallas_src>

<mosaic_0001>
module attributes {stable_mosaic.version = 11 : i64} {
  func.func @_dist2simi_kernel(%arg0: i32, %arg1: i32, %arg2: memref<1xf32, #tpu.memory_space<smem>>, %arg3: memref<1x128x128xf32, #tpu.memory_space<vmem>>, %arg4: memref<1x128x128xf32, #tpu.memory_space<vmem>>) attributes {dimension_semantics = [#tpu.dimension_semantics<parallel>, #tpu.dimension_semantics<parallel>], iteration_bounds = array<i64: 2, 1>, scalar_prefetch = 1 : i64, scratch_operands = 0 : i64, tpu.core_type = #tpu.core_type<tc>, window_params = [{transform_indices = @transform_0, window_bounds = array<i64: 1, 128, 128>}, {transform_indices = @transform_1, window_bounds = array<i64: 1, 128, 128>}]} {
    %c0 = arith.constant 0 : index
    %0 = memref.load %arg2[%c0] : memref<1xf32, #tpu.memory_space<smem>>
    %cst = arith.constant 0.000000e+00 : f32
    %1 = arith.subf %cst, %0 : f32
    %2 = math.exp %1 : f32
    %cst_0 = arith.constant 0.000000e+00 : f32
    %3 = arith.subf %cst_0, %2 : f32
    %c0_1 = arith.constant 0 : index
    %c0_2 = arith.constant 0 : index
    %c0_3 = arith.constant 0 : index
    %4 = vector.load %arg3[%c0_1, %c0_2, %c0_3] : memref<1x128x128xf32, #tpu.memory_space<vmem>>, vector<1x128x128xf32>
    %5 = vector.broadcast %3 : f32 to vector<1x128x128xf32>
    %6 = arith.mulf %4, %5 : vector<1x128x128xf32>
    %7 = math.exp %6 : vector<1x128x128xf32>
    %c0_4 = arith.constant 0 : index
    %c0_5 = arith.constant 0 : index
    %c0_6 = arith.constant 0 : index
    %8 = vector.load %arg4[%c0_4, %c0_5, %c0_6] : memref<1x128x128xf32, #tpu.memory_space<vmem>>, vector<1x128x128xf32>
    tpu.vector_store %arg4[%c0_4, %c0_5, %c0_6], %7 {strides = array<i32>} : memref<1x128x128xf32, #tpu.memory_space<vmem>>, vector<1x128x128xf32>,
    return
  }
  func.func @transform_0(%arg0: i32, %arg1: i32, %arg2: memref<1xf32, #tpu.memory_space<smem>>) -> (i32, i32, i32) {
    %c0_i32 = arith.constant 0 : i32
    %c0_i32_0 = arith.constant 0 : i32
    return %arg0, %arg1, %c0_i32 : i32, i32, i32
  }
  func.func @transform_1(%arg0: i32, %arg1: i32, %arg2: memref<1xf32, #tpu.memory_space<smem>>) -> (i32, i32, i32) {
    %c0_i32 = arith.constant 0 : i32
    %c0_i32_0 = arith.constant 0 : i32
    return %arg0, %arg1, %c0_i32 : i32, i32, i32
  }
}

</mosaic_0001>

<bundles_post_ra>
// kernel: tpu_custom_call.1
= control target key start
LH: loop header
LB: loop body
LE: loop exit
PB: predicated region body
PF: predicated region fallthrough
CT: control target
= control target key end

     0   :  { %s821_s0 = inlined_call_operand.<no memory space> [shape: f32[1], index: 0, kind: input, shape index: {}]   ;;  %s822_s1 = inlined_call_operand.hbm [shape: f32[2,128,128], index: 1, kind: input, shape index: {}]   ;;  %s823_s2 = inlined_call_operand.hbm [shape: f32[2,128,128], index: 2, kind: output, shape index: {}]  }
   0x1   :  { %7 = sst [smem:[#allocation3]] %s821_s0 }
   0x2   :  { %8 = vsyncpa [#allocation5], 0 }
   0x3   :  { %10 = vsyncpa [#allocation5 + $0x1], 0 }
   0x4   :  { %11 = vsyncpa [#allocation6], 0 }
   0x5   :  { %13 = vsyncpa [#allocation6 + $0x1], 0  ;;  %s605_s11 = smov 0   ;;  %s607_s12 = smov 0  }
   0x6   :  { %s609_s13 = smov 0   ;;  %s611_s14 = smov 0  }
   0x7   :  { %s613_s15 = smov 0   ;;  %s615_s16 = smov 0  }
   0x8 LB: > { %s348_s0 = sadd.s32 4294967295, %s579_s16   ;;  %s349_s17 = sadd.s32 4294967294, %s579_s16   ;;  %s579_s16 = sphi %s615_s16, %s19_s16   ;;  %s575_s15 = sphi %s613_s15, %s838_s15   ;;  %s571_s14 = sphi %s611_s14, %s837_s14   ;;  %s567_s13 = sphi %s609_s13, %s836_s13   ;;  %s563_s12 = sphi %s607_s12, %s835_s12   ;;  %s559_s11 = sphi %s605_s11, %s834_s11  }
   0x9   : > { %s31_s18 = sadd.s32 1, %s575_s15  ;;  %s40_s19 = sadd.s32 1, %s567_s13 }
   0xa   : > { %p33_p0 = scmp.ge.s32.totalorder %s31_s18, 2  ;;  %p47_p1 = scmp.ne.s32.totalorder %s567_s13, %s563_s12 }
   0xb   : > { %p48_p2 = scmp.eq.s32.totalorder %s579_s16, 0  ;;  %p53_p3 = scmp.ne.s32.totalorder %s563_s12, %s559_s11 }
   0xc   : > { %s840_s18 = smov (%p33_p0, %s31_s18), 0  ;;  %p54_p5 = scmp.eq.s32.totalorder %s348_s0, 0 }
   0xd   : > { %p646_p4 = por %p48_p2, %p47_p1  ;;  %s35_s21 = ssub.s32 %s575_s15, %s840_s18 }
   0xe   : > { %p79_p6 = scmp.eq.s32.totalorder %s348_s0, 1  ;;  %p38_p7 = scmp.eq.s32.totalorder %s35_s21, 0 }
   0xf   : > { %p652_p8 = por %p54_p5, %p53_p3  ;;  %p85_p10 = scmp.eq.s32.totalorder %s349_s17, 1 }
  0x10   : > { %p656_p9 = por %p79_p6, %p47_p1  ;;  %p379_p13 = scmp.lt.s32.totalorder %s579_s16, 2 }
  0x11   : > { %s661_s24 = scalar_select %p38_p7, %s567_s13, %s40_s19  }
  0x12   : > { %s827_s23 = scalar_select %p656_p9, 1, 0 }
  0x13   : > { %p663_p11 = por %p85_p10, %p53_p3  ;;  %s105_s26 = sand.u32 1, %s567_s13  }
  0x14   : > { %s352_s27 = sshll.u32 %s105_s26, 7  ;;  %s363_s28 = sshll.u32 %s575_s15, 11 }
  0x15   : > { %s828_s25 = scalar_select %p663_p11, 1, 0 }
  0x16   : > { %s674_s3 = scalar_lea.hbm %s822_s1, %s363_s28  ;;  %s109_s4 = scalar_lea.vmem [#allocation4], %s352_s27 }
  0x17   : > { %s118_s5 = sshll.u32 %s109_s4, 4  ;;  %p680_p0 = pnand %p379_p13, %p646_p4  ;;  %s676_s5 = int_to_ptr.vmem [resolvable:$true] %s118_s5 }
  0x18   : > { %s685_s7 = scalar_lea.sflag [#allocation5], %s105_s26  ;;  %s467_s8 = scalar_lea.hbm %s674_s3, 2048 }
  0x19   : > { %p468_p2 = scmp.ne.s32.totalorder %s674_s3, %s467_s8  ;;  %p469_p3 = pneg %p680_p0 }
  0x1a   : > { %s472_s0 = scalar_lea.hbm %s822_s1, 4096  ;;  %p473_p4 = scmp.lt.u32.totalorder %s674_s3, %s822_s1 }
  0x1b   : > { %p470_p5 = pnand %p469_p3, %p468_p2  ;;  %p474_p7 = scmp.lt.u32.totalorder %s472_s0, %s467_s8 }
  0x1c   : > { %p476_p13 = scmp.lt.u32.totalorder %s467_s8, %s674_s3 }
  0x1d   : > { %p471_p6 = pneg %p470_p5  ;;  %p475_p10 = por %p474_p7, %p473_p4 }
  0x1f   : > { %p477_p12 = por %p476_p13, %p475_p10 }
  0x21   : > { %p478_p1 = pnand %p477_p12, %p471_p6 }
  0x23   : > { %481 = shalt.err (!%p478_p1)
}
  0x24   : > { %s482_s20 = scalar_lea.vmem %s676_s5, 2048  ;;  %s581_s21 = smov [#allocation4]  }
  0x25   : > { %p483_p2 = scmp.ne.s32.totalorder %s676_s5, %s482_s20  ;;  %s487_s26 = sshll.u32 %s581_s21, 4  ;;  %s488_s26 = int_to_ptr.vmem [resolvable:$false] %s487_s26 }
  0x26   : > { %s489_s27 = scalar_lea.vmem %s488_s26, 4096  ;;  %p490_p9 = scmp.lt.s32.totalorder %s676_s5, %s488_s26 }
  0x27   : > { %p485_p5 = pnand %p483_p2, %p469_p3  ;;  %p491_p4 = scmp.lt.s32.totalorder %s489_s27, %s482_s20 }
  0x29   : > { %p486_p11 = pneg %p485_p5  ;;  %p492_p7 = por %p491_p4, %p490_p9 }
  0x2b   : > { %p493_p10 = pnand %p492_p7, %p486_p11 }
  0x2d   : > { %496 = shalt.err (!%p493_p10)
}
  0x2e   : > { %s582_s28 = smov 128   ;;  %s583_s29 = smov 8  }
  0x2f   : > { %374 = dma.hbm_to_vmem [thread:$0]  (!%p680_p0), %s674_s3, 2048, %s676_s5, %s685_s7, %s582_s28, %s582_s28, %s583_s29  }
  0x30   : > { %p126_p12 = scmp.lt.s32.totalorder %s579_s16, 3  ;;  %p830_p1 = scmp.ge.s32.totalorder %s579_s16, 1 }
  0x32   : > { %p127_p3 = pnand %p830_p1, %p126_p12 }
  0x33   : > { %s717_s30 = sand.u32 (!%p127_p3), 1, %s563_s12  }
  0x34   : > { %130 = sbr.rel (%p127_p3) target bundleno = 180 (0xb4), region = 24  ;;  %s356_s4 = sshll.u32 (!%p127_p3), %s717_s30, 7 }
  0x35   : > { %s133_s8 = scalar_lea.sflag (!%p127_p3), [#allocation5], %s717_s30  ;;  %s723_s9 = scalar_lea.vmem (!%p127_p3), [#allocation4], %s356_s4 }
  0x3b   : > { %550 = dma.done.wait (%p652_p8), %s133_s8, 2048  }
  0x3c   : > { %552 = vsyncadd (%p652_p8), %s133_s8, 4294965248  ;;  %s157_s3 = sld [smem:[#allocation3]]  ;;  %v164_v3 = vld [vmem:[%s723_s9] sm:$0xff]  ;;  %v165_v4 = vld [vmem:[%s723_s9 + $0x8] sm:$0xff]  ;;  %s747_s22 = scalar_lea.vmem [#allocation7], %s356_s4 }
  0x3d   : > { %v166_v5 = vld [vmem:[%s723_s9 + $0x10] sm:$0xff]  ;;  %v167_v6 = vld [vmem:[%s723_s9 + $0x18] sm:$0xff]  ;;  %v168_v7 = vld [vmem:[%s723_s9 + $0x20] sm:$0xff]  ;;  %s364_s10 = sshll.u32 %s571_s14, 11  ;;  %s261_s0 = sshll.u32 %s747_s22, 4  ;;  %s769_s0 = int_to_ptr.vmem [resolvable:$true] %s261_s0 }
  0x3e   : > { %v169_v9 = vld [vmem:[%s723_s9 + $0x28] sm:$0xff]  ;;  %v170_v13 = vld [vmem:[%s723_s9 + $0x30] sm:$0xff]  ;;  %v171_v15 = vld [vmem:[%s723_s9 + $0x38] sm:$0xff]  ;;  %s767_s20 = scalar_lea.hbm %s823_s2, %s364_s10  ;;  %s246_s14 = scalar_lea.sflag [#allocation6], %s717_s30 }
  0x3f   : > { %v172_v17 = vld [vmem:[%s723_s9 + $0x40] sm:$0xff]  ;;  %v173_v18 = vld [vmem:[%s723_s9 + $0x48] sm:$0xff]  ;;  %v174_v24 = vld [vmem:[%s723_s9 + $0x50] sm:$0xff]  ;;  %s497_s21 = scalar_lea.vmem %s769_s0, 2048  ;;  %p831_p9 = scmp.ne.s32.totalorder %s827_s23, 0 }
  0x40   : > { %v175_v27 = vld [vmem:[%s723_s9 + $0x58] sm:$0xff]  ;;  %v176_v30 = vld [vmem:[%s723_s9 + $0x60] sm:$0xff]  ;;  %v177_v33 = vld [vmem:[%s723_s9 + $0x68] sm:$0xff]  ;;  %p498_p8 = scmp.ne.s32.totalorder %s769_s0, %s497_s21  ;;  %s584_s26 = smov [#allocation7]  }
  0x41   : > { %v178_v36 = vld [vmem:[%s723_s9 + $0x70] sm:$0xff]  ;;  %v179_v39 = vld [vmem:[%s723_s9 + $0x78] sm:$0xff]  ;;  %s501_s27 = sshll.u32 %s584_s26, 4  ;;  %s502_s27 = int_to_ptr.vmem [resolvable:$false] %s501_s27 }
  0x42   : > { %s158_s5 = ssub.f32 0.0, %s157_s3  ;;  %p499_p11 = pnand %p498_p8, %p831_p9 }
  0x43   : > { %s503_s28 = scalar_lea.vmem %s502_s27, 4096  ;;  %p504_p6 = scmp.lt.s32.totalorder %s769_s0, %s502_s27 }
  0x44   : > { %v159_v0 = vstv %s158_s5  ;;  %p500_p0 = pneg %p499_p11  ;;  %p505_p13 = scmp.lt.s32.totalorder %s503_s28, %s497_s21 }
  0x45   : > { %v160_v1 = vmul.f32 1.442695, %v159_v0 }
  0x46   : > { %p506_p2 = por %p505_p13, %p504_p6 }
  0x47   : > { %433 = vpow2.f32 %v160_v1 }
  0x48   : > { %p507_p5 = pnand %p506_p2, %p500_p0 }
  0x51   : > { %v434_v2 = vpop.eup %433 }
  0x52   : > { %365 = vpush %v434_v2 }
  0x83   : > { %s366_s6 = spop %365 }
  0x84   : > { %s163_s7 = ssub.f32 0.0, %s366_s6 }
  0x86   : > { %v180_v8 = vstv %s163_s7 }
  0x87   : > { %v181_v10 = vmul.f32 %v180_v8, %v164_v3  ;;  %v182_v11 = vmul.f32 %v180_v8, %v165_v4  ;;  %v183_v12 = vmul.f32 %v180_v8, %v166_v5  ;;  %v184_v14 = vmul.f32 %v180_v8, %v167_v6 }
  0x88   : > { %v185_v16 = vmul.f32 %v180_v8, %v168_v7  ;;  %v186_v19 = vmul.f32 %v180_v8, %v169_v9  ;;  %v187_v20 = vmul.f32 %v180_v8, %v170_v13  ;;  %v188_v25 = vmul.f32 %v180_v8, %v171_v15 }
  0x89   : > { %v197_v21 = vmul.f32 1.442695, %v181_v10  ;;  %v199_v22 = vmul.f32 1.442695, %v182_v11  ;;  %v201_v23 = vmul.f32 1.442695, %v183_v12  ;;  %v189_v28 = vmul.f32 %v180_v8, %v172_v17 }
  0x8a   : > { %v203_v26 = vmul.f32 1.442695, %v184_v14  ;;  %v205_v29 = vmul.f32 1.442695, %v185_v16  ;;  %v190_v31 = vmul.f32 %v180_v8, %v173_v18  ;;  %v207_v32 = vmul.f32 1.442695, %v186_v19 }
  0x8b   : > { %435 = vpow2.f32 %v197_v21  ;;  %v191_v34 = vmul.f32 %v180_v8, %v174_v24  ;;  %v209_v35 = vmul.f32 1.442695, %v187_v20  ;;  %v192_v37 = vmul.f32 %v180_v8, %v175_v27 }
  0x8c   : > { %437 = vpow2.f32 %v199_v22  ;;  %v211_v38 = vmul.f32 1.442695, %v188_v25  ;;  %v193_v40 = vmul.f32 %v180_v8, %v176_v30  ;;  %v213_v41 = vmul.f32 1.442695, %v189_v28 }
  0x8d   : > { %439 = vpow2.f32 %v201_v23  ;;  %v194_v42 = vmul.f32 %v180_v8, %v177_v33  ;;  %v215_v43 = vmul.f32 1.442695, %v190_v31  ;;  %v195_v44 = vmul.f32 %v180_v8, %v178_v36 }
  0x8e   : > { %441 = vpow2.f32 %v203_v26  ;;  %v217_v45 = vmul.f32 1.442695, %v191_v34  ;;  %v196_v46 = vmul.f32 %v180_v8, %v179_v39  ;;  %v219_v47 = vmul.f32 1.442695, %v192_v37 }
  0x8f   : > { %443 = vpow2.f32 %v205_v29  ;;  %v221_v48 = vmul.f32 1.442695, %v193_v40  ;;  %v223_v49 = vmul.f32 1.442695, %v194_v42  ;;  %v225_v51 = vmul.f32 1.442695, %v195_v44 }
  0x90   : > { %445 = vpow2.f32 %v207_v32  ;;  %v227_v53 = vmul.f32 1.442695, %v196_v46 }
  0x91   : > { %447 = vpow2.f32 %v209_v35 }
  0x92   : > { %449 = vpow2.f32 %v211_v38 }
  0x93   : > { %451 = vpow2.f32 %v213_v41 }
  0x94   : > { %453 = vpow2.f32 %v215_v43 }
  0x95   : > { %v436_v50 = vpop.eup %435  ;;  %455 = vpow2.f32 %v217_v45 }
  0x96   : > { %v438_v52 = vpop.eup %437  ;;  %457 = vpow2.f32 %v219_v47  ;;  %229 = vst [vmem:[%s747_s22] sm:$0xff] %v436_v50 }
  0x97   : > { %v440_v54 = vpop.eup %439  ;;  %459 = vpow2.f32 %v221_v48  ;;  %230 = vst [vmem:[%s747_s22 + $0x8] sm:$0xff] %v438_v52 }
  0x98   : > { %v442_v55 = vpop.eup %441  ;;  %461 = vpow2.f32 %v223_v49  ;;  %231 = vst [vmem:[%s747_s22 + $0x10] sm:$0xff] %v440_v54 }
  0x99   : > { %v444_v56 = vpop.eup %443  ;;  %463 = vpow2.f32 %v225_v51  ;;  %232 = vst [vmem:[%s747_s22 + $0x18] sm:$0xff] %v442_v55 }
  0x9a   : > { %v446_v57 = vpop.eup %445  ;;  %465 = vpow2.f32 %v227_v53  ;;  %233 = vst [vmem:[%s747_s22 + $0x20] sm:$0xff] %v444_v56 }
  0x9b   : > { %v448_v58 = vpop.eup %447  ;;  %234 = vst [vmem:[%s747_s22 + $0x28] sm:$0xff] %v446_v57 }
  0x9c   : > { %v450_v59 = vpop.eup %449  ;;  %235 = vst [vmem:[%s747_s22 + $0x30] sm:$0xff] %v448_v58 }
  0x9d   : > { %v452_v60 = vpop.eup %451  ;;  %236 = vst [vmem:[%s747_s22 + $0x38] sm:$0xff] %v450_v59 }
  0x9e   : > { %v454_v61 = vpop.eup %453  ;;  %237 = vst [vmem:[%s747_s22 + $0x40] sm:$0xff] %v452_v60 }
  0x9f   : > { %v456_v62 = vpop.eup %455  ;;  %238 = vst [vmem:[%s747_s22 + $0x48] sm:$0xff] %v454_v61 }
  0xa0   : > { %v458_v63 = vpop.eup %457  ;;  %239 = vst [vmem:[%s747_s22 + $0x50] sm:$0xff] %v456_v62 }
  0xa1   : > { %v460_v0 = vpop.eup %459  ;;  %240 = vst [vmem:[%s747_s22 + $0x58] sm:$0xff] %v458_v63 }
  0xa2   : > { %v462_v1 = vpop.eup %461  ;;  %241 = vst [vmem:[%s747_s22 + $0x60] sm:$0xff] %v460_v0 }
  0xa3   : > { %v464_v2 = vpop.eup %463  ;;  %242 = vst [vmem:[%s747_s22 + $0x68] sm:$0xff] %v462_v1 }
  0xa4   : > { %v466_v3 = vpop.eup %465  ;;  %243 = vst [vmem:[%s747_s22 + $0x70] sm:$0xff] %v464_v2 }
  0xa5   : > { %244 = vst [vmem:[%s747_s22 + $0x78] sm:$0xff] %v466_v3 }
  0xa6   : > { %510 = shalt.err (!%p507_p5)
}
  0xa7   : > { %s511_s29 = scalar_lea.hbm %s767_s20, 2048  ;;  %s515_s9 = scalar_lea.hbm %s823_s2, 4096 }
  0xa8   : > { %p512_p4 = scmp.ne.s32.totalorder %s767_s20, %s511_s29  ;;  %p516_p12 = scmp.lt.u32.totalorder %s767_s20, %s823_s2 }
  0xa9   : > { %p517_p1 = scmp.lt.u32.totalorder %s515_s9, %s511_s29  ;;  %p519_p8 = scmp.lt.u32.totalorder %s511_s29, %s767_s20 }
  0xaa   : > { %p513_p7 = pnand %p512_p4, %p831_p9 }
  0xab   : > { %p518_p3 = por %p517_p1, %p516_p12 }
  0xac   : > { %p514_p10 = pneg %p513_p7 }
  0xad   : > { %p520_p11 = por %p519_p8, %p518_p3 }
  0xaf   : > { %p521_p0 = pnand %p520_p11, %p514_p10 }
  0xb1   : > { %524 = shalt.err (!%p521_p0)
}
  0xb2   : > { %s585_s6 = smov 128   ;;  %s586_s7 = smov 8  }
  0xb3   : > { %369 = dma.vmem_to_hbm [thread:$0]  (%p831_p9), %s769_s0, 2048, %s767_s20, %s246_s14, %s585_s6, %s585_s6, %s586_s7  }
  0xb4 PF: > { %s276_s22 = sand.u32 1, %s559_s11   ;;  %p832_p6 = scmp.ne.s32.totalorder %s828_s25, 0 }
  0xb5   : > { %p833_p13 = scmp.ge.s32.totalorder %s579_s16, 2  ;;  %s277_s10 = scalar_lea.sflag [#allocation6], %s276_s22 }
  0xb7   : > { %p376_p2 = pnand %p833_p13, %p832_p6 }
  0xb9   : > { %554 = dma.done.wait (!%p376_p2), %s277_s10, 2048  }
  0xba   : > { %556 = vsyncadd (!%p376_p2), %s277_s10, 4294965248  ;;  %s19_s16 = sadd.s32 1, %s579_s16   ;;  %s834_s11 = smov %s563_s12 }
  0xbb   : > { %p16_p5 = scmp.ge.s32.totalorder %s19_s16, 4   ;;  %s835_s12 = smov %s567_s13 }
  0xbc   : > { %s836_s13 = smov %s661_s24  ;;  %s837_s14 = smov %s575_s15 }
  0xbd   : > { %s838_s15 = smov %s840_s18  ;;  %18 = sbr.rel (!%p16_p5) target bundleno = 8 (0x8), region = 69 }
  0xc4   :  { %282 = vsyncpa [#allocation5], 1 }
  0xc5   :  { %284 = vsyncpa [#allocation5 + $0x1], 1 }
  0xc6   :  { %285 = vsyncpa [#allocation6], 1 }
  0xc7   :  { %287 = vsyncpa [#allocation6 + $0x1], 1 }

</bundles_post_ra>
